<compile_context>
chip_gen: v5e
topology: v5e:2x2
jax: 0.10.0
libtpu: 0.0.40
codegen_flags: <defaults>
</compile_context>

<pallas_src>
import numpy as np
import jax
import jax.numpy as jnp
from jax.experimental import pallas as pl
from jax.experimental.pallas import tpu as pltpu


def _round_up(a, b):
    return (a + b - 1) // b * b


def _vmem_config():
    """Generation-aware scoped-VMEM limit and per-input-block byte budget."""
    phys = None
    try:
        info = pltpu.get_tpu_info()
        phys = getattr(info, "vmem_capacity_bytes", None) or getattr(
            info, "vmem_size_bytes", None)
    except Exception:
        phys = None
    if not phys:
        phys = 64 << 20  # conservative fallback = v7x per-TensorCore VMEM
    # v5e/v6e (128 MiB physical) -> 96 MiB scoped limit; v7x (64 MiB/TC) -> 48 MiB.
    limit = min(int(phys) * 3 // 4, 100 << 20)
    # 2 inputs x 2 pipeline buffers + ~2 block-equivalents of f32 intermediates.
    budget = max(2 << 20, (limit - (8 << 20)) // 6)
    return limit, budget


def _make_kernel(c, h, w, n_total, b):
    hw = h * w
    need_tail_mask = (n_total % b) != 0

    def kernel(rows_ref, x_ref, y_ref, out_ref):
        f32 = jnp.float32

        # Linearity: conv(X) - conv(Y) == Laplacian(sum_c (X_c - Y_c)).
        # Read channel slices straight from the refs (no (b, C, HW) diff temp).
        d = x_ref[:, 0, :].astype(f32) - y_ref[:, 0, :].astype(f32)
        for ch in range(1, c):
            d = d + (x_ref[:, ch, :].astype(f32) - y_ref[:, ch, :].astype(f32))

        if need_tail_mask:
            # The last cdiv chunk may extend past N: those block rows hold
            # undefined data, so zero them before they enter the SSE.
            valid = n_total - pl.program_id(0) * b
            batch_ids = jax.lax.broadcasted_iota(jnp.int32, (b, 1), 0)
            d = jnp.where(batch_ids < valid, d, 0.0)

        # Boundary masks built from the rolled row-index map: a rolled-in
        # element contributes iff its source lies in the same image row
        # (horizontal taps) or a vertically adjacent row (vertical taps).
        r = rows_ref[...]  # (1, hw) int32, row index of each flattened pixel

        def same_row(shift):
            return jnp.where(pltpu.roll(r, shift, 1) == r, 1.0, 0.0)

        def adjacent_row(shift):
            dr = pltpu.roll(r, shift, 1) - r
            return jnp.where((dr == 1) | (dr == -1), 1.0, 0.0)

        # Separable zero-padded 3x3 box sum: 4 XLU rolls + 4 masked adds.
        hsum = (d
                + pltpu.roll(d, 1, 1) * same_row(1)
                + pltpu.roll(d, hw - 1, 1) * same_row(hw - 1))
        box = (hsum
               + pltpu.roll(hsum, w, 1) * adjacent_row(w)
               + pltpu.roll(hsum, hw - w, 1) * adjacent_row(hw - w))

        # Laplacian [[-1,-1,-1],[-1,8,-1],[-1,-1,-1]]: 8*d - (box - d) = 9*d - box.
        lap = 9.0 * d - box
        sse = jnp.sum(lap * lap)

        # Lane-dense, unmasked full-tile store of the per-chunk partial SSE.
        out_ref[...] = jnp.full((1, 8, 128), sse, jnp.float32)

    return kernel


def gradient_loss(x, y):
    """x, y: (N, 3, H, W) NCHW -> scalar GradientLoss (matches the PyTorch module)."""
    n, c, h, w = x.shape
    assert c == 3, "GradientLoss is defined for 3-channel inputs"
    assert y.shape == x.shape
    assert h >= 3, "kernel assumes images with at least 3 rows"
    hw = h * w

    # Lane-dense repack: flatten the spatial dims onto the 128-lane axis.
    # Contiguous reshape -> free in XLA (no HBM copy).
    x3 = x.reshape(n, c, hw)
    y3 = y.reshape(n, c, hw)

    # Row-index map of the flattened spatial axis (drives the boundary masks).
    rows = jnp.asarray((np.arange(hw, dtype=np.int32) // w).reshape(1, hw))

    # Batch chunking: largest chunk whose (C->8 padded sublanes) x hw block
    # fits the per-block VMEM budget; cdiv grid with in-kernel tail masking.
    vmem_limit, block_budget = _vmem_config()
    per_img = 8 * _round_up(hw, 128) * 4  # f32 VMEM footprint of one image in a block
    b = max(1, min(n, block_budget // per_img))
    num_chunks = pl.cdiv(n, b)
    if num_chunks < 2 and n >= 2:
        # Give the v7x megacore (2 TensorCores) at least two parallel chunks.
        b = pl.cdiv(n, 2)
        num_chunks = pl.cdiv(n, b)

    kernel = _make_kernel(c=c, h=h, w=w, n_total=n, b=b)

    cost = pl.CostEstimate(
        flops=17 * n * hw,
        transcendentals=0,
        bytes_accessed=2 * n * c * hw * x.dtype.itemsize + num_chunks * 8 * 128 * 4,
    )

    partials = pl.pallas_call(
        kernel,
        out_shape=jax.ShapeDtypeStruct((num_chunks, 8, 128), jnp.float32),
        grid_spec=pltpu.PrefetchScalarGridSpec(
            num_scalar_prefetch=0,
            grid=(num_chunks,),
            in_specs=[
                pl.BlockSpec((1, hw), lambda i: (0, 0)),         # row-index map (tiny)
                pl.BlockSpec((b, c, hw), lambda i: (i, 0, 0)),   # X chunk
                pl.BlockSpec((b, c, hw), lambda i: (i, 0, 0)),   # Y chunk
            ],
            out_specs=pl.BlockSpec((1, 8, 128), lambda i: (i, 0, 0)),
        ),
        compiler_params=pltpu.CompilerParams(
            dimension_semantics=("parallel",),  # chunks independent -> dual-TC on v7x
            vmem_limit_bytes=vmem_limit,
        ),
        cost_estimate=cost,
    )(rows, x3, y3)

    # F.mse_loss(size_average=True): mean over the (N, 1, H, W) conv output.
    return jnp.sum(partials[:, 0, 0]) / float(n * h * w)


def _reference_loss(x, y):
    """Pure-JAX reference of the PyTorch forward (correctness check)."""
    lap = jnp.array([[-1., -1., -1.],
                     [-1., 8., -1.],
                     [-1., -1., -1.]], dtype=jnp.float32)
    weight = jnp.broadcast_to(lap, (1, 3, 3, 3)).astype(jnp.float32)

    def conv(a):
        return jax.lax.conv_general_dilated(
            a, weight, window_strides=(1, 1), padding=((1, 1), (1, 1)),
            dimension_numbers=("NCHW", "OIHW", "NCHW"))

    return jnp.mean((conv(x) - conv(y)) ** 2)


if __name__ == "__main__":
    key = jax.random.PRNGKey(0)
    kx, ky = jax.random.split(key)
    N, C, H, W = 2, 3, 16, 16
    X = jax.random.normal(kx, (N, C, H, W), dtype=jnp.float32)
    Y = jax.random.normal(ky, (N, C, H, W), dtype=jnp.float32)

    loss = jax.block_until_ready(gradient_loss(X, Y))
    ref = jax.block_until_ready(_reference_loss(X, Y))

    # Tolerance covers benign f32 summation-order differences; any tap/layout
    # bug would be >=0.1% off and still trips this check.
    assert jnp.allclose(loss, ref, rtol=1e-4, atol=1e-5), (loss, ref)
    print("KERNEL_OK")
</pallas_src>

<mosaic_0001>
module attributes {stable_mosaic.version = 11 : i64} {
  func.func @kernel(%arg0: i32, %arg1: memref<1x256xi32, #tpu.memory_space<vmem>>, %arg2: memref<1x3x256xf32, #tpu.memory_space<vmem>>, %arg3: memref<1x3x256xf32, #tpu.memory_space<vmem>>, %arg4: memref<1x8x128xf32, #tpu.memory_space<vmem>>) attributes {dimension_semantics = [#tpu.dimension_semantics<parallel>], iteration_bounds = array<i64: 2>, scalar_prefetch = 0 : i64, scratch_operands = 0 : i64, tpu.core_type = #tpu.core_type<tc>, window_params = [{pipeline_mode = #tpu.pipeline_mode<synchronous>, transform_indices = @transform_0, window_bounds = array<i64: 1, 256>}, {transform_indices = @transform_1, window_bounds = array<i64: 1, 3, 256>}, {transform_indices = @transform_2, window_bounds = array<i64: 1, 3, 256>}, {transform_indices = @transform_3, window_bounds = array<i64: 1, 8, 128>}]} {
    %c0 = arith.constant 0 : index
    %c0_0 = arith.constant 0 : index
    %c0_1 = arith.constant 0 : index
    %0 = vector.load %arg2[%c0, %c0_0, %c0_1] : memref<1x3x256xf32, #tpu.memory_space<vmem>>, vector<1x1x256xf32>
    %1 = vector.shape_cast %0 : vector<1x1x256xf32> to vector<1x256xf32>
    %c0_2 = arith.constant 0 : index
    %c0_3 = arith.constant 0 : index
    %c0_4 = arith.constant 0 : index
    %2 = vector.load %arg3[%c0_2, %c0_3, %c0_4] : memref<1x3x256xf32, #tpu.memory_space<vmem>>, vector<1x1x256xf32>
    %3 = vector.shape_cast %2 : vector<1x1x256xf32> to vector<1x256xf32>
    %4 = arith.subf %1, %3 : vector<1x256xf32>
    %c0_5 = arith.constant 0 : index
    %c1 = arith.constant 1 : index
    %c0_6 = arith.constant 0 : index
    %5 = vector.load %arg2[%c0_5, %c1, %c0_6] : memref<1x3x256xf32, #tpu.memory_space<vmem>>, vector<1x1x256xf32>
    %6 = vector.shape_cast %5 : vector<1x1x256xf32> to vector<1x256xf32>
    %c0_7 = arith.constant 0 : index
    %c1_8 = arith.constant 1 : index
    %c0_9 = arith.constant 0 : index
    %7 = vector.load %arg3[%c0_7, %c1_8, %c0_9] : memref<1x3x256xf32, #tpu.memory_space<vmem>>, vector<1x1x256xf32>
    %8 = vector.shape_cast %7 : vector<1x1x256xf32> to vector<1x256xf32>
    %9 = arith.subf %6, %8 : vector<1x256xf32>
    %10 = arith.addf %4, %9 : vector<1x256xf32>
    %c0_10 = arith.constant 0 : index
    %c2 = arith.constant 2 : index
    %c0_11 = arith.constant 0 : index
    %11 = vector.load %arg2[%c0_10, %c2, %c0_11] : memref<1x3x256xf32, #tpu.memory_space<vmem>>, vector<1x1x256xf32>
    %12 = vector.shape_cast %11 : vector<1x1x256xf32> to vector<1x256xf32>
    %c0_12 = arith.constant 0 : index
    %c2_13 = arith.constant 2 : index
    %c0_14 = arith.constant 0 : index
    %13 = vector.load %arg3[%c0_12, %c2_13, %c0_14] : memref<1x3x256xf32, #tpu.memory_space<vmem>>, vector<1x1x256xf32>
    %14 = vector.shape_cast %13 : vector<1x1x256xf32> to vector<1x256xf32>
    %15 = arith.subf %12, %14 : vector<1x256xf32>
    %16 = arith.addf %10, %15 : vector<1x256xf32>
    %c0_15 = arith.constant 0 : index
    %c0_16 = arith.constant 0 : index
    %17 = vector.load %arg1[%c0_15, %c0_16] : memref<1x256xi32, #tpu.memory_space<vmem>>, vector<1x256xi32>
    %c1_i32 = arith.constant 1 : i32
    %18 = tpu.dynamic_rotate %16 by %c1_i32 dim 1 : vector<1x256xf32>, i32 -> vector<1x256xf32>
    %c1_i32_17 = arith.constant 1 : i32
    %19 = tpu.dynamic_rotate %17 by %c1_i32_17 dim 1 : vector<1x256xi32>, i32 -> vector<1x256xi32>
    %20 = arith.cmpi eq, %19, %17 : vector<1x256xi32>
    %cst = arith.constant 1.000000e+00 : f32
    %cst_18 = arith.constant 0.000000e+00 : f32
    %21 = vector.broadcast %cst : f32 to vector<1x256xf32>
    %22 = vector.broadcast %cst_18 : f32 to vector<1x256xf32>
    %23 = arith.select %20, %21, %22 : vector<1x256xi1>, vector<1x256xf32>
    %24 = arith.mulf %18, %23 : vector<1x256xf32>
    %25 = arith.addf %16, %24 : vector<1x256xf32>
    %c255_i32 = arith.constant 255 : i32
    %26 = tpu.dynamic_rotate %16 by %c255_i32 dim 1 : vector<1x256xf32>, i32 -> vector<1x256xf32>
    %c255_i32_19 = arith.constant 255 : i32
    %27 = tpu.dynamic_rotate %17 by %c255_i32_19 dim 1 : vector<1x256xi32>, i32 -> vector<1x256xi32>
    %28 = arith.cmpi eq, %27, %17 : vector<1x256xi32>
    %cst_20 = arith.constant 1.000000e+00 : f32
    %cst_21 = arith.constant 0.000000e+00 : f32
    %29 = vector.broadcast %cst_20 : f32 to vector<1x256xf32>
    %30 = vector.broadcast %cst_21 : f32 to vector<1x256xf32>
    %31 = arith.select %28, %29, %30 : vector<1x256xi1>, vector<1x256xf32>
    %32 = arith.mulf %26, %31 : vector<1x256xf32>
    %33 = arith.addf %25, %32 : vector<1x256xf32>
    %c16_i32 = arith.constant 16 : i32
    %34 = tpu.dynamic_rotate %33 by %c16_i32 dim 1 : vector<1x256xf32>, i32 -> vector<1x256xf32>
    %c16_i32_22 = arith.constant 16 : i32
    %35 = tpu.dynamic_rotate %17 by %c16_i32_22 dim 1 : vector<1x256xi32>, i32 -> vector<1x256xi32>
    %36 = arith.subi %35, %17 : vector<1x256xi32>
    %c1_i32_23 = arith.constant 1 : i32
    %37 = vector.broadcast %c1_i32_23 : i32 to vector<1x256xi32>
    %38 = arith.cmpi eq, %36, %37 : vector<1x256xi32>
    %c-1_i32 = arith.constant -1 : i32
    %39 = vector.broadcast %c-1_i32 : i32 to vector<1x256xi32>
    %40 = arith.cmpi eq, %36, %39 : vector<1x256xi32>
    %41 = arith.ori %38, %40 : vector<1x256xi1>
    %cst_24 = arith.constant 1.000000e+00 : f32
    %cst_25 = arith.constant 0.000000e+00 : f32
    %42 = vector.broadcast %cst_24 : f32 to vector<1x256xf32>
    %43 = vector.broadcast %cst_25 : f32 to vector<1x256xf32>
    %44 = arith.select %41, %42, %43 : vector<1x256xi1>, vector<1x256xf32>
    %45 = arith.mulf %34, %44 : vector<1x256xf32>
    %46 = arith.addf %33, %45 : vector<1x256xf32>
    %c240_i32 = arith.constant 240 : i32
    %47 = tpu.dynamic_rotate %33 by %c240_i32 dim 1 : vector<1x256xf32>, i32 -> vector<1x256xf32>
    %c240_i32_26 = arith.constant 240 : i32
    %48 = tpu.dynamic_rotate %17 by %c240_i32_26 dim 1 : vector<1x256xi32>, i32 -> vector<1x256xi32>
    %49 = arith.subi %48, %17 : vector<1x256xi32>
    %c1_i32_27 = arith.constant 1 : i32
    %50 = vector.broadcast %c1_i32_27 : i32 to vector<1x256xi32>
    %51 = arith.cmpi eq, %49, %50 : vector<1x256xi32>
    %c-1_i32_28 = arith.constant -1 : i32
    %52 = vector.broadcast %c-1_i32_28 : i32 to vector<1x256xi32>
    %53 = arith.cmpi eq, %49, %52 : vector<1x256xi32>
    %54 = arith.ori %51, %53 : vector<1x256xi1>
    %cst_29 = arith.constant 1.000000e+00 : f32
    %cst_30 = arith.constant 0.000000e+00 : f32
    %55 = vector.broadcast %cst_29 : f32 to vector<1x256xf32>
    %56 = vector.broadcast %cst_30 : f32 to vector<1x256xf32>
    %57 = arith.select %54, %55, %56 : vector<1x256xi1>, vector<1x256xf32>
    %58 = arith.mulf %47, %57 : vector<1x256xf32>
    %59 = arith.addf %46, %58 : vector<1x256xf32>
    %cst_31 = arith.constant 9.000000e+00 : f32
    %60 = vector.broadcast %cst_31 : f32 to vector<1x256xf32>
    %61 = arith.mulf %60, %16 : vector<1x256xf32>
    %62 = arith.subf %61, %59 : vector<1x256xf32>
    %63 = arith.mulf %62, %62 : vector<1x256xf32>
    %64 = vector.shape_cast %63 : vector<1x256xf32> to vector<1x1x256xf32>
    %cst_32 = arith.constant dense<0.000000e+00> : vector<1xf32>
    %65 = vector.multi_reduction <add>, %64, %cst_32 [1, 2] : vector<1x1x256xf32> to vector<1xf32>
    %66 = vector.shape_cast %65 : vector<1xf32> to vector<1x1x1xf32>
    %67 = vector.extract %66[0, 0, 0] : f32 from vector<1x1x1xf32>
    %68 = vector.broadcast %67 : f32 to vector<1x8x128xf32>
    %c0_33 = arith.constant 0 : index
    %c0_34 = arith.constant 0 : index
    %c0_35 = arith.constant 0 : index
    %69 = vector.load %arg4[%c0_33, %c0_34, %c0_35] : memref<1x8x128xf32, #tpu.memory_space<vmem>>, vector<1x8x128xf32>
    tpu.vector_store %arg4[%c0_33, %c0_34, %c0_35], %68 {strides = array<i32>} : memref<1x8x128xf32, #tpu.memory_space<vmem>>, vector<1x8x128xf32>,
    return
  }
  func.func @transform_0(%arg0: i32) -> (i32, i32) {
    %c0_i32 = arith.constant 0 : i32
    %c0_i32_0 = arith.constant 0 : i32
    %c0_i32_1 = arith.constant 0 : i32
    return %c0_i32, %c0_i32_0 : i32, i32
  }
  func.func @transform_1(%arg0: i32) -> (i32, i32, i32) {
    %c0_i32 = arith.constant 0 : i32
    %c0_i32_0 = arith.constant 0 : i32
    %c0_i32_1 = arith.constant 0 : i32
    return %arg0, %c0_i32, %c0_i32_0 : i32, i32, i32
  }
  func.func @transform_2(%arg0: i32) -> (i32, i32, i32) {
    %c0_i32 = arith.constant 0 : i32
    %c0_i32_0 = arith.constant 0 : i32
    %c0_i32_1 = arith.constant 0 : i32
    return %arg0, %c0_i32, %c0_i32_0 : i32, i32, i32
  }
  func.func @transform_3(%arg0: i32) -> (i32, i32, i32) {
    %c0_i32 = arith.constant 0 : i32
    %c0_i32_0 = arith.constant 0 : i32
    %c0_i32_1 = arith.constant 0 : i32
    return %arg0, %c0_i32, %c0_i32_0 : i32, i32, i32
  }
}

</mosaic_0001>

<bundles_post_ra>
// kernel: tpu_custom_call.1
= control target key start
LH: loop header
LB: loop body
LE: loop exit
PB: predicated region body
PF: predicated region fallthrough
CT: control target
= control target key end

     0   :  { %8 = vsyncpa [#allocation3], 0  ;;  %s772_s0 = inlined_call_operand.vmem [shape: s32[1,256], index: 0, kind: input, shape index: {}]   ;;  %s773_s1 = inlined_call_operand.vmem [shape: f32[2,3,256], index: 1, kind: input, shape index: {}]   ;;  %s774_s2 = inlined_call_operand.vmem [shape: f32[2,3,256], index: 2, kind: input, shape index: {}]   ;;  %s775_s3 = inlined_call_operand.hbm [shape: f32[2,8,128], index: 3, kind: output, shape index: {}]  }
   0x1   :  { %10 = vsyncpa [#allocation3 + $0x1], 0  ;;  %s595_s12 = smov 0   ;;  %s597_s13 = smov 0  }
   0x2   :  { %s599_s14 = smov 0   ;;  %s601_s15 = smov 0  }
   0x3 LB: > { %s616_s16 = sadd.s32 4294967295, %s568_s15   ;;  %s441_s17 = sadd.s32 4294967294, %s568_s15   ;;  %s568_s15 = sphi %s601_s15, %s781_s15   ;;  %s564_s14 = sphi %s599_s14, %s780_s14   ;;  %s560_s13 = sphi %s597_s13, %s779_s13   ;;  %s556_s12 = sphi %s595_s12, %s778_s12  }
   0x4   : > { %s620_s18 = sadd.s32 1, %s568_s15   ;;  %s96_s19 = sadd.s32 1, %s564_s14 }
   0x5   : > { %s93_s20 = ssub.s32 %s568_s15, %s620_s18  ;;  %p106_p0 = scmp.ne.s32.totalorder %s564_s14, %s560_s13 }
   0x6   : > { %p94_p1 = scmp.eq.s32.totalorder %s93_s20, 0  ;;  %p107_p2 = scmp.eq.s32.totalorder %s616_s16, 1 }
   0x7   : > { %p112_p3 = scmp.ne.s32.totalorder %s560_s13, %s556_s12  ;;  %p113_p4 = scmp.eq.s32.totalorder %s441_s17, 1 }
   0x8   : > { %s631_s21 = scalar_select %p94_p1, %s564_s14, %s96_s19  }
   0x9   : > { %p633_p5 = por %p107_p2, %p106_p0  ;;  %p637_p6 = por %p113_p4, %p112_p3 }
   0xa   : > { %p444_p7 = scmp.ge.s32.totalorder %s568_s15, 1  ;;  %p150_p8 = scmp.lt.s32.totalorder %s568_s15, 3 }
   0xc   : > { %p151_p9 = pnand %p444_p7, %p150_p8 }
   0xd   : > { %p179_p10 = scmp.lt.s32.totalorder (!%p151_p9), %s616_s16, 1  ;;  %s570_s27 = smov (!%p151_p9), 1  }
   0xe   : > { %154 = sbr.rel (%p151_p9) target bundleno = 497 (0x1f1), region = 32  ;;  %s571_s28 = smov (!%p151_p9), 127  }
   0xf   : > { %s572_s9 = smov (!%p151_p9), 16   ;;  %s573_s10 = smov (!%p151_p9), 112  }
  0x10   : > { %s176_s11 = sand.u32 (!%p151_p9), 1, %s560_s13   ;;  %s455_s19 = sshll.u32 (!%p151_p9), %s616_s16, 3 }
  0x11   : > { %s445_s17 = sshll.u32 (!%p151_p9), %s176_s11, 3  ;;  %s365_s25 = scalar_lea.hbm (!%p151_p9), %s775_s3, %s455_s19 }
  0x12   : > { %s355_s30 = scalar_lea.sflag (!%p151_p9), [#allocation3], %s176_s11  ;;  %s526_s7 = scalar_lea.hbm (!%p151_p9), %s775_s3, 16 }
  0x13   : > { %v204_v0 = vld [vmem:[%s772_s0] sm:$0x3]  ;;  %s180_s26 = scalar_select %p179_p10, %s616_s16, 1  ;;  %v214_v17 = vlaneseq  ;;  %v574_v26 = vmov 0.0   ;;  %vm236_vm5 = vcmask 1040384  }
  0x14   : > { %v647_v1 = vperm.slane %v204_v0, 0  ;;  %v652_v2 = vperm.slane %v204_v0, 1 }
  0x15   : > { %s458_s29 = sshll.u32 %s180_s26, 3  ;;  %v674_v18 = vand.u32 127, %v214_v17  ;;  %s178_s26 = scalar_lea.vmem [#allocation2], %s445_s17 }
  0x16   : > { %221 = vrot.lane.b32.xlu0 %v647_v1, %s570_s27  ;;  %247 = vrot.lane.b32.xlu2 %v647_v1, %s571_s28  ;;  %s183_s5 = scalar_lea.vmem %s773_s1, %s458_s29  ;;  %s188_s8 = scalar_lea.vmem %s774_s2, %s458_s29 }
  0x17   : > { %v189_v3 = vld [vmem:[%s183_s5] ss:$4 sm:$0x3]  ;;  %v450_v6 = vld [vmem:[%s183_s5 + $0x1] ss:$4 sm:$0x3] }
  0x18   : > { %v190_v4 = vld [vmem:[%s188_s8] ss:$4 sm:$0x3]  ;;  %v451_v7 = vld [vmem:[%s188_s8 + $0x1] ss:$4 sm:$0x3] }
  0x19   : > { %v191_v5 = vsub.f32 %v189_v3, %v190_v4  ;;  %v196_v8 = vsub.f32 %v450_v6, %v451_v7  ;;  %v452_v9 = vld [vmem:[%s183_s5 + $0x2] ss:$4 sm:$0x3]  ;;  %vm216_vm0 = vcmp.lt.s32.totalorder %v674_v18, 1  ;;  %vm244_vm2 = vcmp.lt.s32.totalorder %v674_v18, 127 }
  0x1a   : > { %v453_v10 = vld [vmem:[%s188_s8 + $0x2] ss:$4 sm:$0x3]  ;;  %vm274_vm7 = vcmp.lt.s32.totalorder %v674_v18, 16  ;;  %vm305_vm8 = vcmp.lt.s32.totalorder %v674_v18, 112 }
  0x1b   : > { %v202_v11 = vsub.f32 %v452_v9, %v453_v10  ;;  %v197_v12 = vadd.f32 %v196_v8, %v191_v5 }
  0x1d   : > { %v662_v13 = vadd.f32 %v202_v11, %v197_v12 }
  0x1e   : > { %223 = vrot.lane.b32.xlu0 %v652_v2, %s570_s27  ;;  %249 = vrot.lane.b32.xlu2 %v652_v2, %s571_s28 }
  0x1f   : > { %v206_v14 = vperm.slane %v662_v13, 0  ;;  %v207_v15 = vperm.slane %v662_v13, 1 }
  0x21   : > { %210 = vrot.lane.b32.xlu1 %v206_v14, %s570_s27 }
  0x26   : > { %240 = vrot.lane.b32.xlu0 %v206_v14, %s571_s28  ;;  %277 = vrot.lane.b32.xlu2 %v647_v1, %s572_s9 }
  0x29   : > { %212 = vrot.lane.b32.xlu1 %v207_v15, %s570_s27  ;;  %s367_s27 = sshll.u32 %s178_s26, 4  ;;  %s368_s27 = int_to_ptr.vmem [resolvable:$true] %s367_s27 }
  0x2e   : > { %310 = vrot.lane.b32.xlu2 %v652_v2, %s573_s10  ;;  %279 = vrot.lane.b32.xlu0 %v652_v2, %s572_s9 }
  0x31   : > { %242 = vrot.lane.b32.xlu1 %v207_v15, %s571_s28  ;;  %s369_s28 = sshll.u32 %s365_s25, 4  ;;  %s370_s28 = int_to_ptr.hbm [resolvable:$true] %s369_s28 }
  0x32   : > { %s520_s4 = sshra.s32 %s370_s28, 4  ;;  %s521_s4 = int_to_ptr.hbm [resolvable:$true] %s520_s4 }
  0x33   : > { %s522_s5 = scalar_lea.hbm %s521_s4, 8  ;;  %p527_p0 = scmp.lt.s32.totalorder %s521_s4, %s775_s3 }
  0x34   : > { %p523_p11 = scmp.ne.s32.totalorder %s521_s4, %s522_s5  ;;  %p528_p1 = scmp.lt.s32.totalorder %s526_s7, %s522_s5 }
  0x36   : > { %p524_p12 = pnand %p523_p11, %p633_p5  ;;  %p529_p2 = por %p528_p1, %p527_p0 }
  0x38   : > { %p525_p13 = pneg %p524_p12 }
  0x39   : > { %308 = vrot.lane.b32.xlu1 %v647_v1, %s573_s10 }
  0x3a   : > { %p530_p3 = pnand %p529_p2, %p525_p13 }
  0x70   : > { %v248_v19 = vpop.permute.xlu2 %247 }
  0x78   : > { %v250_v23 = vpop.permute.xlu2 %249 }
  0x79   : > { %v252_v30 = vsel %vm244_vm2, %v250_v23, %v248_v19  ;;  %v251_v31 = vsel %vm244_vm2, %v248_v19, %v250_v23 }
  0x7a   : > { %vm254_vm4 = vcmp.eq.s32.totalorder %v252_v30, %v652_v2  ;;  %vm253_vm6 = vcmp.eq.s32.totalorder %v251_v31, %v647_v1 }
  0x7b   : > { %v256_v38 = vsel %vm254_vm4, 1.0, %v574_v26  ;;  %v255_v43 = vsel %vm253_vm6, 1.0, %v574_v26 }
  0x80   : > { %v278_v51 = vpop.permute.xlu2 %277 }
  0x88   : > { %v222_v16 = vpop.permute.xlu0 %221  ;;  %v311_v57 = vpop.permute.xlu2 %310 }
  0x90   : > { %v224_v20 = vpop.permute.xlu0 %223 }
  0x91   : > { %v225_v22 = vsel %vm216_vm0, %v222_v16, %v224_v20  ;;  %v226_v25 = vsel %vm216_vm0, %v224_v20, %v222_v16 }
  0x92   : > { %vm228_vm1 = vcmp.eq.s32.totalorder %v225_v22, %v652_v2  ;;  %vm227_vm3 = vcmp.eq.s32.totalorder %v226_v25, %v647_v1 }
  0x93   : > { %v211_v21 = vpop.permute.xlu1 %210  ;;  %v230_v27 = vsel %vm228_vm1, 1.0, %v574_v26  ;;  %v229_v35 = vsel %vm227_vm3, 1.0, %v574_v26 }
  0x98   : > { %v241_v34 = vpop.permute.xlu0 %240 }
  0x9b   : > { %v213_v24 = vpop.permute.xlu1 %212 }
  0x9c   : > { %v217_v28 = vsel %vm216_vm0, %v211_v21, %v213_v24  ;;  %v218_v32 = vsel %vm216_vm0, %v213_v24, %v211_v21  ;;  %v332_v21 = vmul.f32 9.0, %v662_v13 }
  0x9d   : > { %v232_v29 = vmul.f32 %v230_v27, %v217_v28  ;;  %v231_v36 = vmul.f32 %v229_v35, %v218_v32 }
  0x9f   : > { %v235_v33 = vrot.slane %v232_v29, 7 }
  0xa0   : > { %v280_v52 = vpop.permute.xlu0 %279 }
  0xa1   : > { %v237_v41 = vsel %vm236_vm5, %v231_v36, %v235_v33  ;;  %v281_v53 = vsel %vm274_vm7, %v278_v51, %v280_v52  ;;  %v282_v56 = vsel %vm274_vm7, %v280_v52, %v278_v51 }
  0xa2   : > { %v239_v46 = vadd.f32 %v237_v41, %v662_v13  ;;  %v284_v55 = vsub.s32 %v281_v53, %v652_v2  ;;  %v283_v59 = vsub.s32 %v282_v56, %v647_v1 }
  0xa3   : > { %v243_v37 = vpop.permute.xlu1 %242 }
  0xa4   : > { %v245_v39 = vsel %vm244_vm2, %v241_v34, %v243_v37  ;;  %v246_v40 = vsel %vm244_vm2, %v243_v37, %v241_v34  ;;  %vm286_vm9 = vcmp.eq.s32.totalorder %v284_v55, 1  ;;  %vm288_vm10 = vcmp.eq.s32.totalorder %v284_v55, 4294967295 }
  0xa5   : > { %v258_v42 = vmul.f32 %v256_v38, %v246_v40  ;;  %v257_v44 = vmul.f32 %v255_v43, %v245_v39  ;;  %vm290_vm11 = vmor %vm286_vm9, %vm288_vm10  ;;  %vm285_vm12 = vcmp.eq.s32.totalorder %v283_v59, 1  ;;  %vm287_vm13 = vcmp.eq.s32.totalorder %v283_v59, 4294967295 }
  0xa6   : > { %v292_v3 = vsel %vm290_vm11, 1.0, %v574_v26  ;;  %vm289_vm0 = vmor %vm285_vm12, %vm287_vm13 }
  0xa7   : > { %v261_v45 = vrot.slane %v258_v42, 7 }
  0xa9   : > { %v262_v47 = vsel %vm236_vm5, %v257_v44, %v261_v45 }
  0xaa   : > { %v264_v48 = vadd.f32 %v262_v47, %v239_v46 }
  0xab   : > { %v309_v54 = vpop.permute.xlu1 %308 }
  0xac   : > { %v267_v49 = vperm.slane %v264_v48, 1  ;;  %v266_v50 = vperm.slane %v264_v48, 0  ;;  %v313_v58 = vsel %vm305_vm8, %v311_v57, %v309_v54  ;;  %v312_v60 = vsel %vm305_vm8, %v309_v54, %v311_v57 }
  0xad   : > { %v315_v61 = vsub.s32 %v313_v58, %v652_v2  ;;  %v314_v63 = vsub.s32 %v312_v60, %v647_v1  ;;  %v291_v1 = vsel %vm289_vm0, 1.0, %v574_v26 }
  0xae   : > { %272 = vrot.lane.b32.xlu1 %v267_v49, %s572_s9  ;;  %301 = vrot.lane.b32.xlu2 %v266_v50, %s573_s10 }
  0xaf   : > { %270 = vrot.lane.b32.xlu0 %v266_v50, %s572_s9  ;;  %vm317_vm14 = vcmp.eq.s32.totalorder %v315_v61, 1  ;;  %vm319_vm15 = vcmp.eq.s32.totalorder %v315_v61, 4294967295  ;;  %vm316_vm1 = vcmp.eq.s32.totalorder %v314_v63, 1  ;;  %vm318_vm2 = vcmp.eq.s32.totalorder %v314_v63, 4294967295 }
  0xb0   : > { %vm321_vm3 = vmor %vm317_vm14, %vm319_vm15 }
  0xb1   : > { %vm320_vm4 = vmor %vm316_vm1, %vm318_vm2  ;;  %v323_v12 = vsel %vm321_vm3, 1.0, %v574_v26 }
  0xb2   : > { %v322_v16 = vsel %vm320_vm4, 1.0, %v574_v26 }
  0xb7   : > { %303 = vrot.lane.b32.xlu0 %v267_v49, %s573_s10 }
 0x108   : > { %v302_v7 = vpop.permute.xlu2 %301 }
 0x120   : > { %v273_v62 = vpop.permute.xlu1 %272 }
 0x121   : > { %v271_v0 = vpop.permute.xlu0 %270 }
 0x122   : > { %v275_v4 = vsel %vm274_vm7, %v271_v0, %v273_v62  ;;  %v276_v2 = vsel %vm274_vm7, %v273_v62, %v271_v0 }
 0x123   : > { %v294_v5 = vmul.f32 %v292_v3, %v275_v4  ;;  %v293_v8 = vmul.f32 %v291_v1, %v276_v2 }
 0x125   : > { %v297_v6 = vrot.slane %v294_v5, 7 }
 0x127   : > { %v298_v14 = vsel %vm236_vm5, %v293_v8, %v297_v6 }
 0x128   : > { %v300_v20 = vadd.f32 %v298_v14, %v264_v48 }
 0x129   : > { %v304_v9 = vpop.permute.xlu0 %303 }
 0x12a   : > { %v306_v10 = vsel %vm305_vm8, %v302_v7, %v304_v9  ;;  %v307_v11 = vsel %vm305_vm8, %v304_v9, %v302_v7 }
 0x12b   : > { %v325_v15 = vmul.f32 %v323_v12, %v307_v11  ;;  %v324_v17 = vmul.f32 %v322_v16, %v306_v10 }
 0x12d   : > { %v328_v19 = vrot.slane %v325_v15, 7 }
 0x12f   : > { %v329_v22 = vsel %vm236_vm5, %v324_v17, %v328_v19 }
 0x130   : > { %v331_v23 = vadd.f32 %v329_v22, %v300_v20 }
 0x132   : > { %v333_v24 = vsub.f32 %v332_v21, %v331_v23 }
 0x134   : > { %v334_v25 = vmul.f32 %v333_v24, %v333_v24 }
 0x136   : > { %v336_v18 = vperm.slane %v334_v25, 0  ;;  %v337_v27 = vperm.slane %v334_v25, 1 }
 0x138   : > { %v340_v28 = vsel %vm236_vm5, %v336_v18, 0.0  ;;  %v341_v29 = vsel %vm236_vm5, %v337_v27, 0.0 }
 0x139   : > { %v342_v30 = vadd.f32 %v341_v29, %v340_v28 }
 0x13b   : > { %343 = vadd.xlane.f32.xlu1 %v342_v30 }
 0x1ae   : > { %v344_v26 = vpop.xlane.xlu1 %343 }
 0x1af   : > { %v345_v31 = vrot.slane %v344_v26, 4 }
 0x1b1   : > { %v346_v32 = vadd.f32 %v345_v31, %v344_v26 }
 0x1b3   : > { %v347_v33 = vrot.slane %v346_v32, 2 }
 0x1b5   : > { %v348_v13 = vadd.f32 %v347_v33, %v346_v32 }
 0x1b7   : > { %v349_v34 = vrot.slane %v348_v13, 1 }
 0x1b9   : > { %v350_v35 = vadd.f32 %v349_v34, %v348_v13 }
 0x1bb   : > { %460 = vpush %v350_v35 }
 0x1ec   : > { %s461_s29 = spop %460 }
 0x1ed   : > { %v352_v36 = vstv %s461_s29 }
 0x1ee   : > { %353 = vst [vmem:[%s178_s26] sm:$0xff] %v352_v36 }
 0x1ef   : > { %533 = shalt.err (!%p530_p3)
}
 0x1f0   : > { %462 = dma.vmem_to_hbm [thread:$0]  (%p633_p5), %s368_s27, 128, %s370_s28, %s355_s30  }
 0x1f1 PF: > { %p468_p4 = scmp.ge.s32.totalorder %s568_s15, 2  ;;  %s381_s10 = sand.u32 1, %s556_s12  }
 0x1f2   : > { %s382_s11 = scalar_lea.sflag [#allocation3], %s381_s10 }
 0x1f3   : > { %p465_p7 = pnand %p468_p4, %p637_p6 }
 0x1f5   : > { %p466_p8 = pneg %p465_p7 }
 0x1f7   : > { %551 = dma.done.wait (%p466_p8), %s382_s11, 128  }
 0x1f8   : > { %553 = vsyncadd (%p466_p8), %s382_s11, 4294967168  ;;  %p13_p9 = scmp.ge.s32.totalorder %s620_s18, 4   ;;  %s778_s12 = smov %s560_s13 }
 0x1f9   : > { %s779_s13 = smov %s564_s14  ;;  %s780_s14 = smov %s631_s21 }
 0x1fa   : > { %s781_s15 = smov %s620_s18  ;;  %15 = sbr.rel (!%p13_p9) target bundleno = 3 (0x3), region = 74 }
 0x1ff   :  { %388 = vsyncpa [#allocation3], 1 }
 0x200   :  { %390 = vsyncpa [#allocation3 + $0x1], 1 }

</bundles_post_ra>
